<compile_context>
chip_gen: v6e
topology: v6e:2x2x1
jax: 0.10.0
libtpu: 0.0.40
codegen_flags: <defaults>
</compile_context>

<pallas_src>
import functools

import jax
import jax.numpy as jnp
from jax.experimental import pallas as pl
from jax.experimental.pallas import tpu as pltpu


def _round_up(v, m):
    return (v + m - 1) // m * m


def _pad_to(a, axis, target, value=0.0):
    pad = target - a.shape[axis]
    if pad <= 0:
        return a
    widths = [(0, 0)] * a.ndim
    widths[axis] = (0, pad)
    return jnp.pad(a, widths, constant_values=value)


def _vmem_block_bytes(rows, cols, itemsize):
    """Bytes one (rows, cols) block really occupies in VMEM (8x128 tiling)."""
    return _round_up(max(rows, 1), 8) * _round_up(max(cols, 1), 128) * itemsize


def _stream_spec(shape, index_map, nbuf):
    """BlockSpec for a streamed operand; >2 buffers only if supported."""
    if nbuf > 2 and hasattr(pl, "Buffered"):
        try:
            return pl.BlockSpec(shape, index_map, pipeline_mode=pl.Buffered(nbuf))
        except TypeError:
            pass
    return pl.BlockSpec(shape, index_map)


def _in_n_out_kernel(logits_ref, x_ref, w1_ref, b1_ref, w2_ref, b2_ref,
                     out_ref, *, inv_nclass):
    # --- MLP scaling model: 2 MXU matmuls + VPU/EUP elementwise (f32) ---
    h = jnp.dot(x_ref[...], w1_ref[...], preferred_element_type=jnp.float32)
    h = jnp.maximum(h + b1_ref[...], 0.0)                 # lin1 + ReLU
    # TODO(synk): nn.Dropout is identity in eval mode; training-mode dropout
    # (pltpu.prng_*) is intentionally omitted.
    t = jnp.dot(h.astype(w2_ref.dtype), w2_ref[...],
                preferred_element_type=jnp.float32) + b2_ref[...]
    # Softplus (beta=1): logaddexp(0, t) is the numerically-stable form and
    # matches torch.nn.Softplus.  Padded class lanes were biased to -1e4 at
    # prep time, so softplus there is exactly 0.0 and the plain sum below is
    # already the mean over the logical classes.
    t = jnp.logaddexp(jnp.float32(0.0), t)
    t_mean = jnp.sum(t, axis=1, keepdims=True) * jnp.float32(inv_nclass)

    # --- cat((-logits, logits), dim=1) * t : single full-tile store ---
    scaled = logits_ref[...].astype(jnp.float32) * t_mean
    out_ref[...] = jnp.concatenate([-scaled, scaled], axis=1).astype(out_ref.dtype)


def in_n_out_forward(logits, x, w1, b1, w2, b2, *, bf16_matmul=True,
                     stream_buffers=2):
    """IN_N_OUT forward pass as one batch-tiled Pallas TPU kernel call."""
    B, C = logits.shape
    nfeat, nhid = w1.shape
    nclass = w2.shape[1]

    # --- weight prep: zero-pad hidden dim, pad extra class lanes of b2 with
    #     -1e4 so softplus(pad) == 0.0 exactly (no in-kernel mask needed). ---
    nhid_p = _round_up(nhid, 128)
    ncls_p = _round_up(nclass, 128)
    w1p = _pad_to(w1, 1, nhid_p)
    b1p = _pad_to(b1.reshape(1, -1), 1, nhid_p)
    w2p = _pad_to(_pad_to(w2, 0, nhid_p), 1, ncls_p)
    b2p = _pad_to(b2.reshape(1, -1), 1, ncls_p, value=-1e4)

    # logits/output stay in the caller's dtype (no wrapper upcast); all
    # elementwise math inside the kernel is f32 regardless.
    out_dtype = logits.dtype
    if bf16_matmul:
        # MXU takes bf16 natively on v5e/v6e/v7x; halves the dominant x and
        # weight HBM streams on this bandwidth-bound kernel.
        x = x.astype(jnp.bfloat16)
        w1p = w1p.astype(jnp.bfloat16)
        w2p = w2p.astype(jnp.bfloat16)
    else:
        x = x.astype(jnp.float32)
        w1p = w1p.astype(jnp.float32)
        w2p = w2p.astype(jnp.float32)

    bytes_x = jnp.dtype(x.dtype).itemsize
    bytes_w = jnp.dtype(w1p.dtype).itemsize
    bytes_lg = jnp.dtype(logits.dtype).itemsize
    bytes_out = jnp.dtype(out_dtype).itemsize

    # --- generation-aware scoped VMEM limit: conservative on v7x (64 MiB
    #     physical per TC), up to ~90 MiB on v5e/v6e (128 MiB physical). ---
    try:
        phys_vmem = int(pltpu.get_tpu_info().vmem_capacity_bytes)
    except Exception:  # pragma: no cover - older jax / CPU tracing fallback
        phys_vmem = 64 * 1024 * 1024
    vmem_limit = min(int(phys_vmem * 0.7), 96 * 1024 * 1024)

    # --- padding-aware VMEM accounting ---
    nbuf = max(2, int(stream_buffers))
    # Resident weight/bias blocks (constant index_map); count x2 conservatively
    # in case the pipeline still allocates two buffers for them.
    resident = 2 * (_vmem_block_bytes(nfeat, nhid_p, bytes_w)
                    + _vmem_block_bytes(1, nhid_p, 4)
                    + _vmem_block_bytes(nhid_p, ncls_p, bytes_w)
                    + _vmem_block_bytes(1, ncls_p, 4))
    # Streamed blocks, lane-padded to 128, times the buffer count.
    per_row = nbuf * (_round_up(C, 128) * bytes_lg
                      + _round_up(nfeat, 128) * bytes_x
                      + _round_up(2 * C, 128) * bytes_out)
    # f32 intermediates (h, t, scaled, concat result) live once per tile.
    per_row += (nhid_p + ncls_p + _round_up(C, 128)
                + 2 * _round_up(2 * C, 128)) * 4

    headroom = 4 * 1024 * 1024          # compiler-internal scratch, epilogues
    tile_budget = max(vmem_limit - resident - headroom, 8 * per_row)
    tb = tile_budget // per_row          # VMEM budget is the binding constraint
    tb = min(tb, _round_up(B, 8))
    if B >= 16:
        # Guarantee >=2 grid tiles so the "parallel" batch axis can shard
        # across both TensorCores on v7x; ~free on single-TC chips.
        tb = min(tb, _round_up(pl.cdiv(B, 2), 8))
    tb = max(8, (tb // 8) * 8)
    n_tiles = pl.cdiv(B, tb)

    cost = pl.CostEstimate(
        flops=2 * B * (nfeat * nhid + nhid * nclass),
        transcendentals=2 * B * nclass,                   # exp + log in softplus
        bytes_accessed=(B * nfeat * bytes_x + B * C * bytes_lg
                        + B * 2 * C * bytes_out
                        + (w1p.size + w2p.size) * bytes_w
                        + (b1p.size + b2p.size) * 4),
    )

    kernel = functools.partial(_in_n_out_kernel, inv_nclass=1.0 / nclass)

    return pl.pallas_call(
        kernel,
        grid=(n_tiles,),
        in_specs=[
            _stream_spec((tb, C), lambda i: (i, 0), nbuf),      # logits (streamed)
            _stream_spec((tb, nfeat), lambda i: (i, 0), nbuf),  # x      (streamed)
            pl.BlockSpec((nfeat, nhid_p), lambda i: (0, 0)),    # w1 (VMEM-resident)
            pl.BlockSpec((1, nhid_p), lambda i: (0, 0)),        # b1
            pl.BlockSpec((nhid_p, ncls_p), lambda i: (0, 0)),   # w2
            pl.BlockSpec((1, ncls_p), lambda i: (0, 0)),        # b2
        ],
        out_specs=_stream_spec((tb, 2 * C), lambda i: (i, 0), nbuf),
        out_shape=jax.ShapeDtypeStruct((B, 2 * C), out_dtype),
        compiler_params=pltpu.CompilerParams(
            dimension_semantics=("parallel",),
            vmem_limit_bytes=int(vmem_limit),
        ),
        cost_estimate=cost,
    )(logits, x, w1p, b1p, w2p, b2p)


def _reference(logits, x, w1, b1, w2, b2):
    """Pure-JAX reference mirroring the PyTorch module (eval mode)."""
    h = jnp.maximum(x @ w1 + b1, 0.0)
    t = h @ w2 + b2
    t = jnp.logaddexp(0.0, t)
    t = jnp.mean(t, axis=1, keepdims=True)
    logits2 = jnp.concatenate([-logits, logits], axis=1)
    return logits2 * t


if __name__ == "__main__":
    # Small shapes consistent with the module's forward:
    #   x: [B, nfeat], logits: [B, C]; MLP: nfeat -> nhid -> nclass
    B, C = 8, 4
    nfeat, nhid, nclass = 32, 32, 16

    key = jax.random.PRNGKey(0)
    k_logits, k_x, k_w1, k_b1, k_w2, k_b2 = jax.random.split(key, 6)

    logits = jax.random.normal(k_logits, (B, C), dtype=jnp.float32)
    x = jax.random.normal(k_x, (B, nfeat), dtype=jnp.float32)

    # Deterministic parameter init matching nn.Linear's U(-1/sqrt(fan_in), +)
    bound1 = 1.0 / (nfeat ** 0.5)
    bound2 = 1.0 / (nhid ** 0.5)
    w1 = jax.random.uniform(k_w1, (nfeat, nhid), jnp.float32, -bound1, bound1)
    b1 = jax.random.uniform(k_b1, (1, nhid), jnp.float32, -bound1, bound1)
    w2 = jax.random.uniform(k_w2, (nhid, nclass), jnp.float32, -bound2, bound2)
    b2 = jax.random.uniform(k_b2, (1, nclass), jnp.float32, -bound2, bound2)

    ref = _reference(logits, x, w1, b1, w2, b2)

    # Exact-math path (f32 MXU): tight tolerance vs. the reference.
    out_f32 = in_n_out_forward(logits, x, w1, b1, w2, b2, bf16_matmul=False)
    out_f32 = jax.block_until_ready(out_f32)
    assert out_f32.shape == (B, 2 * C), out_f32.shape
    assert jnp.allclose(out_f32, ref, atol=1e-5, rtol=1e-5), (
        float(jnp.max(jnp.abs(out_f32 - ref))))

    # Default fast path (bf16 MXU inputs, f32 accumulation/elementwise):
    # looser tolerance because the matmul inputs are rounded to bf16.
    out_bf16 = in_n_out_forward(logits, x, w1, b1, w2, b2)
    out_bf16 = jax.block_until_ready(out_bf16)
    assert out_bf16.shape == (B, 2 * C), out_bf16.shape
    assert jnp.allclose(out_bf16, ref, atol=5e-2, rtol=5e-2), (
        float(jnp.max(jnp.abs(out_bf16 - ref))))

    print("KERNEL_OK")
</pallas_src>

<mosaic_0001>
module attributes {stable_mosaic.version = 11 : i64} {
  func.func @_in_n_out_kernel(%arg0: i32, %arg1: memref<8x4xf32, #tpu.memory_space<vmem>>, %arg2: memref<8x32xf32, #tpu.memory_space<vmem>>, %arg3: memref<32x128xf32, #tpu.memory_space<vmem>>, %arg4: memref<1x128xf32, #tpu.memory_space<vmem>>, %arg5: memref<128x128xf32, #tpu.memory_space<vmem>>, %arg6: memref<1x128xf32, #tpu.memory_space<vmem>>, %arg7: memref<8x8xf32, #tpu.memory_space<vmem>>) attributes {dimension_semantics = [#tpu.dimension_semantics<parallel>], iteration_bounds = array<i64: 1>, scalar_prefetch = 0 : i64, scratch_operands = 0 : i64, tpu.core_type = #tpu.core_type<tc>, window_params = [{transform_indices = @transform_0, window_bounds = array<i64: 8, 4>}, {transform_indices = @transform_1, window_bounds = array<i64: 8, 32>}, {pipeline_mode = #tpu.pipeline_mode<synchronous>, transform_indices = @transform_2, window_bounds = array<i64: 32, 128>}, {pipeline_mode = #tpu.pipeline_mode<synchronous>, transform_indices = @transform_3, window_bounds = array<i64: 1, 128>}, {pipeline_mode = #tpu.pipeline_mode<synchronous>, transform_indices = @transform_4, window_bounds = array<i64: 128, 128>}, {pipeline_mode = #tpu.pipeline_mode<synchronous>, transform_indices = @transform_5, window_bounds = array<i64: 1, 128>}, {transform_indices = @transform_6, window_bounds = array<i64: 8, 8>}]} {
    %c0 = arith.constant 0 : index
    %c0_0 = arith.constant 0 : index
    %0 = vector.load %arg2[%c0, %c0_0] : memref<8x32xf32, #tpu.memory_space<vmem>>, vector<8x32xf32>
    %c0_1 = arith.constant 0 : index
    %c0_2 = arith.constant 0 : index
    %1 = vector.load %arg3[%c0_1, %c0_2] : memref<32x128xf32, #tpu.memory_space<vmem>>, vector<32x128xf32>
    %cst = arith.constant dense<0.000000e+00> : vector<8x128xf32>
    %2 = tpu.matmul %0, %1, %cst {dimension_numbers = #tpu.dot_dimension_numbers<[1], [0], [0], [1], [0, 0, 1, 1], [], []>} : vector<8x32xf32>, vector<32x128xf32>, vector<8x128xf32> -> vector<8x128xf32>
    %c0_3 = arith.constant 0 : index
    %c0_4 = arith.constant 0 : index
    %3 = vector.load %arg4[%c0_3, %c0_4] : memref<1x128xf32, #tpu.memory_space<vmem>>, vector<1x128xf32>
    %4 = vector.broadcast %3 : vector<1x128xf32> to vector<8x128xf32>
    %5 = arith.addf %2, %4 : vector<8x128xf32>
    %cst_5 = arith.constant 0.000000e+00 : f32
    %6 = vector.broadcast %cst_5 : f32 to vector<8x128xf32>
    %7 = arith.maximumf %5, %6 : vector<8x128xf32>
    %c0_6 = arith.constant 0 : index
    %c0_7 = arith.constant 0 : index
    %8 = vector.load %arg5[%c0_6, %c0_7] : memref<128x128xf32, #tpu.memory_space<vmem>>, vector<128x128xf32>
    %cst_8 = arith.constant dense<0.000000e+00> : vector<8x128xf32>
    %9 = tpu.matmul %7, %8, %cst_8 {dimension_numbers = #tpu.dot_dimension_numbers<[1], [0], [0], [1], [0, 0, 1, 1], [], []>} : vector<8x128xf32>, vector<128x128xf32>, vector<8x128xf32> -> vector<8x128xf32>
    %c0_9 = arith.constant 0 : index
    %c0_10 = arith.constant 0 : index
    %10 = vector.load %arg6[%c0_9, %c0_10] : memref<1x128xf32, #tpu.memory_space<vmem>>, vector<1x128xf32>
    %11 = vector.broadcast %10 : vector<1x128xf32> to vector<8x128xf32>
    %12 = arith.addf %9, %11 : vector<8x128xf32>
    %cst_11 = arith.constant 0.000000e+00 : f32
    %13 = vector.broadcast %cst_11 : f32 to vector<8x128xf32>
    %14 = arith.maximumf %13, %12 : vector<8x128xf32>
    %15 = vector.broadcast %cst_11 : f32 to vector<8x128xf32>
    %16 = arith.subf %15, %12 : vector<8x128xf32>
    %17 = arith.cmpf one, %16, %16 : vector<8x128xf32>
    %18 = vector.broadcast %cst_11 : f32 to vector<8x128xf32>
    %19 = arith.addf %18, %12 : vector<8x128xf32>
    %20 = math.absf %16 : vector<8x128xf32>
    %cst_12 = arith.constant 0.000000e+00 : f32
    %21 = vector.broadcast %cst_12 : f32 to vector<8x128xf32>
    %22 = arith.subf %21, %20 : vector<8x128xf32>
    %23 = math.exp %22 : vector<8x128xf32>
    %24 = math.log1p %23 : vector<8x128xf32>
    %25 = arith.addf %14, %24 : vector<8x128xf32>
    %26 = arith.select %17, %19, %25 : vector<8x128xi1>, vector<8x128xf32>
    %cst_13 = arith.constant dense<0.000000e+00> : vector<8xf32>
    %27 = vector.multi_reduction <add>, %26, %cst_13 [1] : vector<8x128xf32> to vector<8xf32>
    %28 = vector.shape_cast %27 : vector<8xf32> to vector<8x1xf32>
    %cst_14 = arith.constant 6.250000e-02 : f32
    %29 = vector.broadcast %cst_14 : f32 to vector<8x1xf32>
    %30 = arith.mulf %28, %29 : vector<8x1xf32>
    %c0_15 = arith.constant 0 : index
    %c0_16 = arith.constant 0 : index
    %31 = vector.load %arg1[%c0_15, %c0_16] : memref<8x4xf32, #tpu.memory_space<vmem>>, vector<8x4xf32>
    %32 = vector.broadcast %30 : vector<8x1xf32> to vector<8x4xf32>
    %33 = arith.mulf %31, %32 : vector<8x4xf32>
    %cst_17 = arith.constant 0.000000e+00 : f32
    %34 = vector.broadcast %cst_17 : f32 to vector<8x4xf32>
    %35 = arith.subf %34, %33 : vector<8x4xf32>
    %36 = tpu.concatenate %35, %33 in 1 : vector<8x4xf32>, vector<8x4xf32> -> vector<8x8xf32>
    %c0_18 = arith.constant 0 : index
    %c0_19 = arith.constant 0 : index
    %37 = vector.load %arg7[%c0_18, %c0_19] : memref<8x8xf32, #tpu.memory_space<vmem>>, vector<8x8xf32>
    tpu.vector_store %arg7[%c0_18, %c0_19], %36 {strides = array<i32>} : memref<8x8xf32, #tpu.memory_space<vmem>>, vector<8x8xf32>,
    return
  }
  func.func @transform_0(%arg0: i32) -> (i32, i32) {
    %c0_i32 = arith.constant 0 : i32
    %c0_i32_0 = arith.constant 0 : i32
    return %arg0, %c0_i32 : i32, i32
  }
  func.func @transform_1(%arg0: i32) -> (i32, i32) {
    %c0_i32 = arith.constant 0 : i32
    %c0_i32_0 = arith.constant 0 : i32
    return %arg0, %c0_i32 : i32, i32
  }
  func.func @transform_2(%arg0: i32) -> (i32, i32) {
    %c0_i32 = arith.constant 0 : i32
    %c0_i32_0 = arith.constant 0 : i32
    %c0_i32_1 = arith.constant 0 : i32
    return %c0_i32, %c0_i32_0 : i32, i32
  }
  func.func @transform_3(%arg0: i32) -> (i32, i32) {
    %c0_i32 = arith.constant 0 : i32
    %c0_i32_0 = arith.constant 0 : i32
    %c0_i32_1 = arith.constant 0 : i32
    return %c0_i32, %c0_i32_0 : i32, i32
  }
  func.func @transform_4(%arg0: i32) -> (i32, i32) {
    %c0_i32 = arith.constant 0 : i32
    %c0_i32_0 = arith.constant 0 : i32
    %c0_i32_1 = arith.constant 0 : i32
    return %c0_i32, %c0_i32_0 : i32, i32
  }
  func.func @transform_5(%arg0: i32) -> (i32, i32) {
    %c0_i32 = arith.constant 0 : i32
    %c0_i32_0 = arith.constant 0 : i32
    %c0_i32_1 = arith.constant 0 : i32
    return %c0_i32, %c0_i32_0 : i32, i32
  }
  func.func @transform_6(%arg0: i32) -> (i32, i32) {
    %c0_i32 = arith.constant 0 : i32
    %c0_i32_0 = arith.constant 0 : i32
    return %arg0, %c0_i32 : i32, i32
  }
}

</mosaic_0001>

<bundles_post_ra>
// kernel: tpu_custom_call.1
= control target key start
LH: loop header
LB: loop body
LE: loop exit
PB: predicated region body
PF: predicated region fallthrough
CT: control target
= control target key end

     0   :  { %11 = vsyncpa [#allocation3], 0  ;;  %s516_s0 = inlined_call_operand.vmem [shape: f32[8,4], index: 0, kind: input, shape index: {}]   ;;  %s517_s1 = inlined_call_operand.vmem [shape: f32[8,32], index: 1, kind: input, shape index: {}]   ;;  %s518_s2 = inlined_call_operand.hbm [shape: f32[32,128], index: 2, kind: input, shape index: {}]   ;;  %s519_s3 = inlined_call_operand.vmem [shape: f32[1,128], index: 3, kind: input, shape index: {}]   ;;  %s520_s4 = inlined_call_operand.hbm [shape: f32[128,128], index: 4, kind: input, shape index: {}]   ;;  %s521_s5 = inlined_call_operand.vmem [shape: f32[1,128], index: 5, kind: input, shape index: {}]   ;;  %s522_s6 = inlined_call_operand.hbm [shape: f32[8,8], index: 6, kind: output, shape index: {}]  }
   0x1   :  { %12 = vsyncpa [#allocation6], 0 }
   0x2   :  { %13 = vsyncpa [#allocation4], 0  ;;  %s430_s21 = smov [#allocation2]  }
   0x3   :  { %s23_s22 = sshll.u32 %s430_s21, 4  ;;  %s24_s22 = int_to_ptr.vmem [resolvable:$true] %s23_s22 }
   0x4   :  { %s372_s23 = scalar_lea.vmem %s24_s22, 512  ;;  %p377_p1 = scmp.lt.s32.totalorder %s24_s22, %s24_s22 }
   0x5   :  { %p373_p0 = scmp.ne.s32.totalorder %s24_s22, %s372_s23  ;;  %p378_p2 = scmp.lt.s32.totalorder %s372_s23, %s372_s23 }
   0x7   :  { %p379_p3 = por %p378_p2, %p377_p1 }
   0x9   :  { %p380_p4 = pnand %p379_p3, %p373_p0 }
   0xb   :  { %383 = shalt.err (!%p380_p4)
}
   0xc   :  { %s431_s24 = smov 128   ;;  %s432_s25 = smov 8  }
   0xd   :  { %29 = dma.hbm_to_vmem [thread:$0]  %s518_s2, 512, %s24_s22, [#allocation3], %s431_s24, %s431_s24, %s432_s25  }
   0xe   :  { %s433_s28 = smov [#allocation5]  }
   0xf   :  { %s37_s29 = sshll.u32 %s433_s28, 4  ;;  %s38_s29 = int_to_ptr.vmem [resolvable:$true] %s37_s29 }
  0x10   :  { %s392_s30 = scalar_lea.vmem %s38_s29, 2048  ;;  %p397_p6 = scmp.lt.s32.totalorder %s38_s29, %s38_s29 }
  0x11   :  { %p393_p5 = scmp.ne.s32.totalorder %s38_s29, %s392_s30  ;;  %p398_p7 = scmp.lt.s32.totalorder %s392_s30, %s392_s30 }
  0x13   :  { %p399_p8 = por %p398_p7, %p397_p6 }
  0x15   :  { %p400_p9 = pnand %p399_p8, %p393_p5 }
  0x17   :  { %403 = shalt.err (!%p400_p9)
}
  0x18   :  { %43 = dma.hbm_to_vmem [thread:$0]  %s520_s4, 2048, %s38_s29, [#allocation6], %s431_s24, %s431_s24, %s432_s25  }
  0x19   :  { %424 = dma.done.wait [#allocation3], 512  }
  0x1a   :  { %425 = vsyncadd [#allocation3], 4294966784 }
  0x1b   :  { %426 = dma.done.wait [#allocation6], 2048  }
  0x1c   :  { %427 = vsyncadd [#allocation6], 4294965248  ;;  %v434_v0 = vmov 0.0   ;;  %vm435_vm0 = vmmov 0   ;;  %v56_v1 = vld [vmem:[#allocation2 + $0x18] sm:$0xff]  ;;  %v55_v2 = vld [vmem:[#allocation2 + $0x10] sm:$0xff] }
  0x1d   :  { %306 = vmatprep.subr.mxu0 %v434_v0  ;;  %314 = vmatprep.mubr.msk.f32.mxu0 %vm435_vm0, %v434_v0  ;;  %v154_v3 = vld [vmem:[#allocation5 + $0x78] sm:$0xff]  ;;  %v54_v4 = vld [vmem:[#allocation2 + $0x8] sm:$0xff]  ;;  %v153_v5 = vld [vmem:[#allocation5 + $0x70] sm:$0xff]  ;;  %vm64_vm1 = vcmask 261120   ;;  %s436_s12 = smov 4   ;;  %s437_s13 = smov [#allocation7]  }
  0x1e   :  { %317 = vmatprep.subr.mxu1 %v434_v0  ;;  %349 = vmatprep.mubr.msk.f32.mxu1 %vm435_vm0, %v434_v0  ;;  %v152_v6 = vld [vmem:[#allocation5 + $0x68] sm:$0xff]  ;;  %v53_v7 = vld [vmem:[#allocation2] sm:$0xff]  ;;  %v150_v10 = vld [vmem:[#allocation5 + $0x58] sm:$0xff]  ;;  %s271_s14 = sshll.u32 %s437_s13, 4  ;;  %vm261_vm4 = vcmask 31744   ;;  %vm263_vm5 = vcmask 64512   ;;  %s272_s14 = int_to_ptr.vmem [resolvable:$true] %s271_s14 }
  0x1f   :  { %307 = vmatpush3.msra.mxu0 %v56_v1  ;;  %318 = vmatpush3.msra.mxu1 %v154_v3  ;;  %v52_v8 = vld [vmem:[%s517_s1] sm:$0xff]  ;;  %v149_v11 = vld [vmem:[#allocation5 + $0x50] sm:$0xff]  ;;  %v148_v12 = vld [vmem:[#allocation5 + $0x48] sm:$0xff]  ;;  %s404_s15 = scalar_lea.vmem %s272_s14, 128  ;;  %p409_p11 = scmp.lt.s32.totalorder %s272_s14, %s272_s14 }
  0x20   :  { %308 = vmatprep.subr.mxu0 %v434_v0  ;;  %319 = vmatprep.subr.mxu1 %v434_v0  ;;  %v151_v9 = vld [vmem:[#allocation5 + $0x60] sm:$0xff]  ;;  %v146_v14 = vld [vmem:[#allocation5 + $0x38] sm:$0xff]  ;;  %v145_v15 = vld [vmem:[#allocation5 + $0x30] sm:$0xff]  ;;  %p405_p10 = scmp.ne.s32.totalorder %s272_s14, %s404_s15  ;;  %p410_p12 = scmp.lt.s32.totalorder %s404_s15, %s404_s15 }
  0x21   :  { %309 = vmatpush3.msra.mxu0 %v55_v2  ;;  %320 = vmatpush3.msra.mxu1 %v153_v5  ;;  %v147_v13 = vld [vmem:[#allocation5 + $0x40] sm:$0xff]  ;;  %v144_v16 = vld [vmem:[#allocation5 + $0x28] sm:$0xff]  ;;  %v142_v18 = vld [vmem:[#allocation5 + $0x18] sm:$0xff] }
  0x22   :  { %310 = vmatprep.subr.mxu0 %v434_v0  ;;  %321 = vmatprep.subr.mxu1 %v434_v0  ;;  %v143_v17 = vld [vmem:[#allocation5 + $0x20] sm:$0xff]  ;;  %v141_v19 = vld [vmem:[#allocation5 + $0x10] sm:$0xff]  ;;  %v140_v20 = vld [vmem:[#allocation5 + $0x8] sm:$0xff]  ;;  %p411_p13 = por %p410_p12, %p409_p11 }
  0x23   :  { %311 = vmatpush3.msra.mxu0 %v54_v4  ;;  %322 = vmatpush3.msra.mxu1 %v152_v6  ;;  %v139_v21 = vld [vmem:[#allocation5] sm:$0xff] }
  0x24   :  { %312 = vmatprep.subr.mxu0 %v434_v0  ;;  %323 = vmatprep.subr.mxu1 %v434_v0  ;;  %v281_v22 = vld [vmem:[%s519_s3] ss:$0 sm:$0xff]  ;;  %p412_p0 = pnand %p411_p13, %p405_p10 }
  0x25   :  { %313 = vmatpush3.msra.mxu0 %v53_v7  ;;  %324 = vmatpush3.msra.mxu1 %v151_v9  ;;  %v283_v27 = vld [vmem:[%s521_s5] ss:$0 sm:$0xff] }
  0x26   :  { %315 = vmatmul.mubr.msk.f32.vlgmr.msra.gmra.mxu0 %vm64_vm1, %v52_v8  ;;  %325 = vmatprep.subr.mxu1 %v434_v0  ;;  %v254_v47 = vld [vmem:[%s516_s0] sm:$0xff] }
  0x27   :  { %326 = vmatpush3.msra.mxu1 %v150_v10 }
  0x28   :  { %327 = vmatprep.subr.mxu1 %v434_v0 }
  0x29   :  { %328 = vmatpush3.msra.mxu1 %v149_v11 }
  0x2a   :  { %329 = vmatprep.subr.mxu1 %v434_v0 }
  0x2b   :  { %330 = vmatpush3.msra.mxu1 %v148_v12 }
  0x2c   :  { %331 = vmatprep.subr.mxu1 %v434_v0 }
  0x2d   :  { %332 = vmatpush3.msra.mxu1 %v147_v13 }
  0x2e   :  { %333 = vmatprep.subr.mxu1 %v434_v0 }
  0x2f   :  { %334 = vmatpush3.msra.mxu1 %v146_v14 }
  0x30   :  { %335 = vmatprep.subr.mxu1 %v434_v0 }
  0x31   :  { %336 = vmatpush3.msra.mxu1 %v145_v15 }
  0x32   :  { %337 = vmatprep.subr.mxu1 %v434_v0 }
  0x33   :  { %338 = vmatpush3.msra.mxu1 %v144_v16 }
  0x34   :  { %339 = vmatprep.subr.mxu1 %v434_v0 }
  0x35   :  { %340 = vmatpush3.msra.mxu1 %v143_v17 }
  0x36   :  { %341 = vmatprep.subr.mxu1 %v434_v0 }
  0x37   :  { %342 = vmatpush3.msra.mxu1 %v142_v18 }
  0x38   :  { %343 = vmatprep.subr.mxu1 %v434_v0 }
  0x39   :  { %344 = vmatpush3.msra.mxu1 %v141_v19 }
  0x3a   :  { %345 = vmatprep.subr.mxu1 %v434_v0 }
  0x3b   :  { %346 = vmatpush3.msra.mxu1 %v140_v20 }
  0x3c   :  { %347 = vmatprep.subr.mxu1 %v434_v0 }
  0x3d   :  { %348 = vmatpush3.msra.mxu1 %v139_v21 }
  0xe6   :  { %v134_v23 = vpop.f32.mrf.mxu0 }
  0xe7   :  { %v135_v24 = vadd.f32 %v281_v22, %v134_v23 }
  0xe8   :  { %v316_v25 = vpop.f32.mrf.mxu0 }
  0xe9   :  { %v138_v26 = vmax.f32 %v135_v24, 0.0 }
  0xeb   :  { %350 = vmatmul.mubr.f32.vlgmr.msra.gmra.mxu1 %v138_v26 }
 0x1ab   :  { %v228_v28 = vpop.f32.mrf.mxu1 }
 0x1ac   :  { %v229_v29 = vadd.f32 %v283_v27, %v228_v28 }
 0x1ad   :  { %v351_v30 = vpop.f32.mrf.mxu1 }
 0x1ae   :  { %v233_v31 = vsub.f32 0.0, %v229_v29  ;;  %v232_v43 = vmax.f32 %v229_v29, 0.0 }
 0x1b0   :  { %v236_v32 = vand.u32 2147483647, %v233_v31  ;;  %vm234_vm3 = vcmp.ne.f32.partialorder %v233_v31, %v233_v31 }
 0x1b2   :  { %v237_v33 = vsub.f32 0.0, %v236_v32 }
 0x1b4   :  { %v238_v34 = vmul.f32 1.442695, %v237_v33 }
 0x1b6   :  { %360 = vpow2.f32 %v238_v34 }
 0x1c3   :  { %v361_v35 = vpop.eup %360 }
 0x1c4   :  { %v240_v36 = vadd.f32 1.0, %v361_v35  ;;  %v243_v37 = vmul.f32 -0.5, %v361_v35  ;;  %v246_v39 = vand.u32 2147483647, %v361_v35 }
 0x1c6   :  { %362 = vlog2.f32 %v240_v36  ;;  %v244_v38 = vadd.f32 1.0, %v243_v37  ;;  %vm247_vm2 = vcmp.lt.f32.partialorder %v246_v39, 0.0004427343 }
 0x1c8   :  { %v245_v42 = vmul.f32 %v361_v35, %v244_v38 }
 0x1d3   :  { %v363_v40 = vpop.eup %362 }
 0x1d4   :  { %v242_v41 = vmul.f32 0.6931472, %v363_v40 }
 0x1d6   :  { %v248_v44 = vsel %vm247_vm2, %v245_v42, %v242_v41 }
 0x1d7   :  { %v249_v45 = vadd.f32 %v248_v44, %v232_v43 }
 0x1d9   :  { %v250_v46 = vsel %vm234_vm3, %v229_v29, %v249_v45 }
 0x1da   :  { %251 = vadd.xlane.f32.xlu0 %v250_v46 }
 0x263   :  { %v252_v48 = vpop.xlane.xlu0 %251 }
 0x264   :  { %v253_v49 = vmul.f32 0.0625, %v252_v48 }
 0x266   :  { %v255_v50 = vmul.f32 %v254_v47, %v253_v49 }
 0x268   :  { %258 = vrot.lane.b32.xlu0 %v255_v50, %s436_s12  ;;  %v256_v51 = vsub.f32 0.0, %v255_v50 }
 0x2da   :  { %v259_v52 = vpop.permute.xlu0 %258 }
 0x2db   :  { %v262_v53 = vsel %vm261_vm4, %v256_v51, %v259_v52 }
 0x2dc   :  { %264 = vst.msk [vmem:[#allocation7] sm:$0xff] %vm263_vm5, %v262_v53 }
 0x2dd   :  { %415 = shalt.err (!%p412_p0)
}
 0x2de   :  { %274 = dma.vmem_to_hbm [thread:$0]  %s272_s14, 128, %s522_s6, [#allocation4]  }
 0x2df   :  { %428 = dma.done.wait [#allocation4], 128  }
 0x2e0   :  { %429 = vsyncadd [#allocation4], 4294967168 }
 0x2e1   :  { %278 = vsyncpa [#allocation3], 1 }
 0x2e2   :  { %279 = vsyncpa [#allocation6], 1 }
 0x2e3   :  { %280 = vsyncpa [#allocation4], 1 }

</bundles_post_ra>
